<compile_context>
chip_gen: v7x
topology: tpu7x:2x2x1
jax: 0.10.0
libtpu: 0.0.40
codegen_flags: <defaults>
</compile_context>

<pallas_src>
import functools

import jax
import jax.numpy as jnp
from jax.experimental import pallas as pl
from jax.experimental.pallas import tpu as pltpu


def _round_up(x, m):
    return ((x + m - 1) // m) * m


# ---------------------------------------------------------------------------
# Kernel 1: tiled im2col matmul (the convolution), K-reduction on grid axis 1,
# plus per-channel sum / sum-of-squares accumulation for BatchNorm statistics.
# conv_ref (fp32) is the resident accumulator across the K sweep; sum/sq are
# resident (1, Coutp) accumulators across the whole grid.
# ---------------------------------------------------------------------------
def _conv_stats_kernel(p_ref, w_ref, conv_ref, sum_ref, sq_ref):
    i = pl.program_id(0)
    k = pl.program_id(1)
    nk = pl.num_programs(1)

    @pl.when(jnp.logical_and(i == 0, k == 0))
    def _():
        sum_ref[...] = jnp.zeros_like(sum_ref)
        sq_ref[...] = jnp.zeros_like(sq_ref)

    @pl.when(k == 0)
    def _():
        conv_ref[...] = jnp.zeros_like(conv_ref)

    conv_ref[...] += jnp.dot(p_ref[...], w_ref[...],
                             preferred_element_type=jnp.float32)

    @pl.when(k == nk - 1)
    def _():
        y = conv_ref[...]
        # zero-padded M rows give zero conv rows -> no masking needed.
        sum_ref[...] += jnp.sum(y, axis=0, keepdims=True)
        sq_ref[...] += jnp.sum(y * y, axis=0, keepdims=True)


# ---------------------------------------------------------------------------
# Kernel 2: BN as a precomputed per-channel affine (scale, shift) + LeakyReLU.
# ---------------------------------------------------------------------------
def _bn_lrelu_kernel(conv_ref, scale_ref, shift_ref, out_ref, *, slope):
    y = conv_ref[...] * scale_ref[...] + shift_ref[...]
    out_ref[...] = jnp.where(y >= 0.0, y, slope * y)


# ---------------------------------------------------------------------------
# Glue: im2col (bf16) + wrapper
# ---------------------------------------------------------------------------
def _im2col(x_nhwc, kh=4, kw=4, stride=2, pad=1):
    n, h, w, c = x_nhwc.shape
    xp = jnp.pad(x_nhwc, ((0, 0), (pad, pad), (pad, pad), (0, 0)))
    ho = (h + 2 * pad - kh) // stride + 1
    wo = (w + 2 * pad - kw) // stride + 1
    cols = []
    for i in range(kh):
        for j in range(kw):
            cols.append(xp[:, i:i + stride * ho:stride, j:j + stride * wo:stride, :])
    patches = jnp.stack(cols, axis=3)                     # (N, Ho, Wo, kh*kw, Cin)
    return patches.reshape(n * ho * wo, kh * kw * c), ho, wo


def unet_down(x_nchw, weight, gamma, beta, *, normalize=True, dropout=0.0,
              eps=1e-5, slope=0.2):
    """Forward pass of UNetDown. x_nchw: (N, Cin, H, W) -> (N, Cout, H//2, W//2)."""
    # TODO(synk): dropout > 0 (training-mode nn.Dropout) not implemented.
    assert dropout == 0.0

    n, cin, h, w = x_nchw.shape
    cout = weight.shape[0]

    # bf16 patches / weight: halves HBM traffic and feeds the MXU natively.
    # TODO(synk): fold patch extraction into the kernel (grid over the 16 taps)
    # to remove the ~4x im2col HBM blow-up entirely.
    x_nhwc = jnp.transpose(x_nchw, (0, 2, 3, 1)).astype(jnp.bfloat16)
    patches, ho, wo = _im2col(x_nhwc)                      # (M, K) bf16
    m, kdim = patches.shape

    # weight (Cout, Cin, kh, kw) -> (kh, kw, Cin, Cout) -> (K, Cout), bf16
    w_mat = jnp.transpose(weight, (2, 3, 1, 0)).reshape(kdim, cout).astype(jnp.bfloat16)

    # ---- tiling (re-derived so it fits v5e/v6e/v7x VMEM comfortably) -------
    cout_p = _round_up(cout, 128)                          # lane-dense outputs
    tm = 512 if m >= 512 else _round_up(m, 16)             # big M tile
    mp = _round_up(m, tm)
    num_m = mp // tm
    kp0 = _round_up(kdim, 128)
    tk = min(kp0, 512)                                     # K tile (multiple of 128)
    kp = _round_up(kdim, tk)
    num_k = kp // tk

    patches = jnp.pad(patches, ((0, mp - m), (0, kp - kdim)))
    w_mat = jnp.pad(w_mat, ((0, kp - kdim), (0, cout_p - cout)))

    vmem_limit = 48 * 1024 * 1024

    # ---- pass 1: conv + per-channel stats -----------------------------------
    # TODO(synk): on v7x, split the stats reduction into per-core partials
    # (leading parallel axis of size 2) to use both TensorCores for this pass.
    conv, ssum, ssq = pl.pallas_call(
        _conv_stats_kernel,
        grid=(num_m, num_k),
        in_specs=[pl.BlockSpec((tm, tk), lambda i, k: (i, k)),
                  pl.BlockSpec((tk, cout_p), lambda i, k: (k, 0))],
        out_specs=[pl.BlockSpec((tm, cout_p), lambda i, k: (i, 0)),
                   pl.BlockSpec((1, cout_p), lambda i, k: (0, 0)),
                   pl.BlockSpec((1, cout_p), lambda i, k: (0, 0))],
        out_shape=[jax.ShapeDtypeStruct((mp, cout_p), jnp.float32),
                   jax.ShapeDtypeStruct((1, cout_p), jnp.float32),
                   jax.ShapeDtypeStruct((1, cout_p), jnp.float32)],
        compiler_params=pltpu.CompilerParams(
            dimension_semantics=("arbitrary", "arbitrary"),
            vmem_limit_bytes=vmem_limit),
    )(patches, w_mat)

    # ---- per-channel scale/shift (tiny, plain JAX) --------------------------
    if normalize:
        gamma_p = jnp.pad(gamma.astype(jnp.float32), (0, cout_p - cout)).reshape(1, cout_p)
        beta_p = jnp.pad(beta.astype(jnp.float32), (0, cout_p - cout)).reshape(1, cout_p)
        mean = ssum / float(m)
        var = jnp.maximum(ssq / float(m) - mean * mean, 0.0)   # biased variance
        scale = gamma_p * jax.lax.rsqrt(var + eps)
        shift = beta_p - mean * scale
    else:
        scale = jnp.ones((1, cout_p), jnp.float32)
        shift = jnp.zeros((1, cout_p), jnp.float32)

    # ---- pass 2: BN affine + LeakyReLU (conv buffer aliased into output) ----
    out_flat = pl.pallas_call(
        functools.partial(_bn_lrelu_kernel, slope=slope),
        grid=(num_m,),
        in_specs=[pl.BlockSpec((tm, cout_p), lambda i: (i, 0)),
                  pl.BlockSpec((1, cout_p), lambda i: (0, 0)),
                  pl.BlockSpec((1, cout_p), lambda i: (0, 0))],
        out_specs=pl.BlockSpec((tm, cout_p), lambda i: (i, 0)),
        out_shape=jax.ShapeDtypeStruct((mp, cout_p), jnp.float32),
        input_output_aliases={0: 0},
        compiler_params=pltpu.CompilerParams(
            dimension_semantics=("parallel",),
            vmem_limit_bytes=vmem_limit),
    )(conv, scale, shift)

    out = out_flat[:m, :cout].reshape(n, ho, wo, cout)
    return jnp.transpose(out, (0, 3, 1, 2))                # back to NCHW


# ---------------------------------------------------------------------------
# Pure-JAX reference (for correctness check)
# ---------------------------------------------------------------------------
def unet_down_ref(x_nchw, weight, gamma, beta, *, eps=1e-5, slope=0.2):
    x_nhwc = jnp.transpose(x_nchw, (0, 2, 3, 1)).astype(jnp.float32)
    w_hwio = jnp.transpose(weight, (2, 3, 1, 0)).astype(jnp.float32)
    y = jax.lax.conv_general_dilated(
        x_nhwc, w_hwio, window_strides=(2, 2), padding=[(1, 1), (1, 1)],
        dimension_numbers=("NHWC", "HWIO", "NHWC"))
    mean = jnp.mean(y, axis=(0, 1, 2), keepdims=True)
    var = jnp.mean((y - mean) ** 2, axis=(0, 1, 2), keepdims=True)  # biased
    yn = (y - mean) * jax.lax.rsqrt(var + eps) * gamma + beta
    yn = jnp.where(yn >= 0.0, yn, slope * yn)
    return jnp.transpose(yn, (0, 3, 1, 2))


if __name__ == "__main__":
    key = jax.random.PRNGKey(0)
    kx, kw = jax.random.split(key)

    N, CIN, H, W = 2, 4, 16, 16
    COUT = 8

    x = jax.random.normal(kx, (N, CIN, H, W), dtype=jnp.float32)
    weight = jax.random.normal(kw, (COUT, CIN, 4, 4), dtype=jnp.float32) * 0.1
    gamma = jnp.ones((COUT,), dtype=jnp.float32)   # BatchNorm weight init
    beta = jnp.zeros((COUT,), dtype=jnp.float32)   # BatchNorm bias init

    fwd = jax.jit(unet_down)
    out = jax.block_until_ready(fwd(x, weight, gamma, beta))

    ref = unet_down_ref(x, weight, gamma, beta)
    assert out.shape == (N, COUT, H // 2, W // 2), out.shape
    # bf16 matmul inputs -> looser tolerance vs the fp32 reference
    assert jnp.max(jnp.abs(out - ref)) < 5e-2, float(jnp.max(jnp.abs(out - ref)))

    print("KERNEL_OK")
</pallas_src>

<mosaic_0001>
module attributes {stable_mosaic.version = 11 : i64} {
  func.func @_bn_lrelu_kernel(%arg0: i32, %arg1: memref<128x128xf32, #tpu.memory_space<vmem>>, %arg2: memref<1x128xf32, #tpu.memory_space<vmem>>, %arg3: memref<1x128xf32, #tpu.memory_space<vmem>>, %arg4: memref<128x128xf32, #tpu.memory_space<vmem>>) attributes {dimension_semantics = [#tpu.dimension_semantics<parallel>], iteration_bounds = array<i64: 1>, scalar_prefetch = 0 : i64, scratch_operands = 0 : i64, tpu.core_type = #tpu.core_type<tc>, window_params = [{transform_indices = @transform_0, window_bounds = array<i64: 128, 128>}, {pipeline_mode = #tpu.pipeline_mode<synchronous>, transform_indices = @transform_1, window_bounds = array<i64: 1, 128>}, {pipeline_mode = #tpu.pipeline_mode<synchronous>, transform_indices = @transform_2, window_bounds = array<i64: 1, 128>}, {transform_indices = @transform_3, window_bounds = array<i64: 128, 128>}]} {
    %c0 = arith.constant 0 : index
    %c0_0 = arith.constant 0 : index
    %0 = vector.load %arg1[%c0, %c0_0] : memref<128x128xf32, #tpu.memory_space<vmem>>, vector<128x128xf32>
    %c0_1 = arith.constant 0 : index
    %c0_2 = arith.constant 0 : index
    %1 = vector.load %arg2[%c0_1, %c0_2] : memref<1x128xf32, #tpu.memory_space<vmem>>, vector<1x128xf32>
    %2 = vector.broadcast %1 : vector<1x128xf32> to vector<128x128xf32>
    %3 = arith.mulf %0, %2 : vector<128x128xf32>
    %c0_3 = arith.constant 0 : index
    %c0_4 = arith.constant 0 : index
    %4 = vector.load %arg3[%c0_3, %c0_4] : memref<1x128xf32, #tpu.memory_space<vmem>>, vector<1x128xf32>
    %5 = vector.broadcast %4 : vector<1x128xf32> to vector<128x128xf32>
    %6 = arith.addf %3, %5 : vector<128x128xf32>
    %cst = arith.constant 0.000000e+00 : f32
    %7 = vector.broadcast %cst : f32 to vector<128x128xf32>
    %8 = arith.cmpf oge, %6, %7 : vector<128x128xf32>
    %cst_5 = arith.constant 2.000000e-01 : f32
    %9 = vector.broadcast %cst_5 : f32 to vector<128x128xf32>
    %10 = arith.mulf %9, %6 : vector<128x128xf32>
    %11 = arith.select %8, %6, %10 : vector<128x128xi1>, vector<128x128xf32>
    %c0_6 = arith.constant 0 : index
    %c0_7 = arith.constant 0 : index
    %12 = vector.load %arg4[%c0_6, %c0_7] : memref<128x128xf32, #tpu.memory_space<vmem>>, vector<128x128xf32>
    tpu.vector_store %arg4[%c0_6, %c0_7], %11 {strides = array<i32>} : memref<128x128xf32, #tpu.memory_space<vmem>>, vector<128x128xf32>,
    return
  }
  func.func @transform_0(%arg0: i32) -> (i32, i32) {
    %c0_i32 = arith.constant 0 : i32
    %c0_i32_0 = arith.constant 0 : i32
    return %arg0, %c0_i32 : i32, i32
  }
  func.func @transform_1(%arg0: i32) -> (i32, i32) {
    %c0_i32 = arith.constant 0 : i32
    %c0_i32_0 = arith.constant 0 : i32
    %c0_i32_1 = arith.constant 0 : i32
    return %c0_i32, %c0_i32_0 : i32, i32
  }
  func.func @transform_2(%arg0: i32) -> (i32, i32) {
    %c0_i32 = arith.constant 0 : i32
    %c0_i32_0 = arith.constant 0 : i32
    %c0_i32_1 = arith.constant 0 : i32
    return %c0_i32, %c0_i32_0 : i32, i32
  }
  func.func @transform_3(%arg0: i32) -> (i32, i32) {
    %c0_i32 = arith.constant 0 : i32
    %c0_i32_0 = arith.constant 0 : i32
    return %arg0, %c0_i32 : i32, i32
  }
}

module attributes {stable_mosaic.version = 11 : i64} {
  func.func @_conv_stats_kernel(%arg0: i32, %arg1: i32, %arg2: memref<128x128xbf16, #tpu.memory_space<vmem>>, %arg3: memref<128x128xbf16, #tpu.memory_space<vmem>>, %arg4: memref<128x128xf32, #tpu.memory_space<vmem>>, %arg5: memref<1x128xf32, #tpu.memory_space<vmem>>, %arg6: memref<1x128xf32, #tpu.memory_space<vmem>>) attributes {dimension_semantics = [#tpu.dimension_semantics<arbitrary>, #tpu.dimension_semantics<arbitrary>], iteration_bounds = array<i64: 1, 1>, scalar_prefetch = 0 : i64, scratch_operands = 0 : i64, tpu.core_type = #tpu.core_type<tc>, window_params = [{transform_indices = @transform_0, window_bounds = array<i64: 128, 128>}, {transform_indices = @transform_1, window_bounds = array<i64: 128, 128>}, {transform_indices = @transform_2, window_bounds = array<i64: 128, 128>}, {pipeline_mode = #tpu.pipeline_mode<synchronous>, transform_indices = @transform_3, window_bounds = array<i64: 1, 128>}, {pipeline_mode = #tpu.pipeline_mode<synchronous>, transform_indices = @transform_4, window_bounds = array<i64: 1, 128>}]} {
    %c0_i32 = arith.constant 0 : i32
    %0 = arith.cmpi eq, %arg0, %c0_i32 : i32
    %c0_i32_0 = arith.constant 0 : i32
    %1 = arith.cmpi eq, %arg1, %c0_i32_0 : i32
    %2 = arith.andi %0, %1 : i1
    %3 = arith.extui %2 : i1 to i32
    %c0_i32_1 = arith.constant 0 : i32
    %4 = arith.cmpi ne, %3, %c0_i32_1 : i32
    scf.if %4 {
      %cst_13 = arith.constant 0.000000e+00 : f32
      %17 = vector.broadcast %cst_13 : f32 to vector<1x128xf32>
      %c0_14 = arith.constant 0 : index
      %c0_15 = arith.constant 0 : index
      %18 = vector.load %arg5[%c0_14, %c0_15] : memref<1x128xf32, #tpu.memory_space<vmem>>, vector<1x128xf32>
      tpu.vector_store %arg5[%c0_14, %c0_15], %17 {strides = array<i32>} : memref<1x128xf32, #tpu.memory_space<vmem>>, vector<1x128xf32>,
      %cst_16 = arith.constant 0.000000e+00 : f32
      %19 = vector.broadcast %cst_16 : f32 to vector<1x128xf32>
      %c0_17 = arith.constant 0 : index
      %c0_18 = arith.constant 0 : index
      %20 = vector.load %arg6[%c0_17, %c0_18] : memref<1x128xf32, #tpu.memory_space<vmem>>, vector<1x128xf32>
      tpu.vector_store %arg6[%c0_17, %c0_18], %19 {strides = array<i32>} : memref<1x128xf32, #tpu.memory_space<vmem>>, vector<1x128xf32>,
    } else {
    }
    %c0_i32_2 = arith.constant 0 : i32
    %5 = arith.cmpi eq, %arg1, %c0_i32_2 : i32
    %6 = arith.extui %5 : i1 to i32
    %c0_i32_3 = arith.constant 0 : i32
    %7 = arith.cmpi ne, %6, %c0_i32_3 : i32
    scf.if %7 {
      %cst_13 = arith.constant 0.000000e+00 : f32
      %17 = vector.broadcast %cst_13 : f32 to vector<128x128xf32>
      %c0_14 = arith.constant 0 : index
      %c0_15 = arith.constant 0 : index
      %18 = vector.load %arg4[%c0_14, %c0_15] : memref<128x128xf32, #tpu.memory_space<vmem>>, vector<128x128xf32>
      tpu.vector_store %arg4[%c0_14, %c0_15], %17 {strides = array<i32>} : memref<128x128xf32, #tpu.memory_space<vmem>>, vector<128x128xf32>,
    } else {
    }
    %c0 = arith.constant 0 : index
    %c0_4 = arith.constant 0 : index
    %8 = vector.load %arg4[%c0, %c0_4] : memref<128x128xf32, #tpu.memory_space<vmem>>, vector<128x128xf32>
    %c0_5 = arith.constant 0 : index
    %c0_6 = arith.constant 0 : index
    %9 = vector.load %arg2[%c0_5, %c0_6] : memref<128x128xbf16, #tpu.memory_space<vmem>>, vector<128x128xbf16>
    %c0_7 = arith.constant 0 : index
    %c0_8 = arith.constant 0 : index
    %10 = vector.load %arg3[%c0_7, %c0_8] : memref<128x128xbf16, #tpu.memory_space<vmem>>, vector<128x128xbf16>
    %cst = arith.constant dense<0.000000e+00> : vector<128x128xf32>
    %11 = tpu.matmul %9, %10, %cst {dimension_numbers = #tpu.dot_dimension_numbers<[1], [0], [0], [1], [0, 0, 1, 1], [], []>} : vector<128x128xbf16>, vector<128x128xbf16>, vector<128x128xf32> -> vector<128x128xf32>
    %12 = arith.addf %8, %11 : vector<128x128xf32>
    %c0_9 = arith.constant 0 : index
    %c0_10 = arith.constant 0 : index
    %13 = vector.load %arg4[%c0_9, %c0_10] : memref<128x128xf32, #tpu.memory_space<vmem>>, vector<128x128xf32>
    tpu.vector_store %arg4[%c0_9, %c0_10], %12 {strides = array<i32>} : memref<128x128xf32, #tpu.memory_space<vmem>>, vector<128x128xf32>,
    %c0_i32_11 = arith.constant 0 : i32
    %14 = arith.cmpi eq, %arg1, %c0_i32_11 : i32
    %15 = arith.extui %14 : i1 to i32
    %c0_i32_12 = arith.constant 0 : i32
    %16 = arith.cmpi ne, %15, %c0_i32_12 : i32
    scf.if %16 {
      %c0_13 = arith.constant 0 : index
      %c0_14 = arith.constant 0 : index
      %17 = vector.load %arg4[%c0_13, %c0_14] : memref<128x128xf32, #tpu.memory_space<vmem>>, vector<128x128xf32>
      %c0_15 = arith.constant 0 : index
      %c0_16 = arith.constant 0 : index
      %18 = vector.load %arg5[%c0_15, %c0_16] : memref<1x128xf32, #tpu.memory_space<vmem>>, vector<1x128xf32>
      %cst_17 = arith.constant dense<0.000000e+00> : vector<128xf32>
      %19 = vector.multi_reduction <add>, %17, %cst_17 [0] : vector<128x128xf32> to vector<128xf32>
      %20 = vector.shape_cast %19 : vector<128xf32> to vector<1x128xf32>
      %21 = arith.addf %18, %20 : vector<1x128xf32>
      %c0_18 = arith.constant 0 : index
      %c0_19 = arith.constant 0 : index
      %22 = vector.load %arg5[%c0_18, %c0_19] : memref<1x128xf32, #tpu.memory_space<vmem>>, vector<1x128xf32>
      tpu.vector_store %arg5[%c0_18, %c0_19], %21 {strides = array<i32>} : memref<1x128xf32, #tpu.memory_space<vmem>>, vector<1x128xf32>,
      %c0_20 = arith.constant 0 : index
      %c0_21 = arith.constant 0 : index
      %23 = vector.load %arg6[%c0_20, %c0_21] : memref<1x128xf32, #tpu.memory_space<vmem>>, vector<1x128xf32>
      %24 = arith.mulf %17, %17 : vector<128x128xf32>
      %cst_22 = arith.constant dense<0.000000e+00> : vector<128xf32>
      %25 = vector.multi_reduction <add>, %24, %cst_22 [0] : vector<128x128xf32> to vector<128xf32>
      %26 = vector.shape_cast %25 : vector<128xf32> to vector<1x128xf32>
      %27 = arith.addf %23, %26 : vector<1x128xf32>
      %c0_23 = arith.constant 0 : index
      %c0_24 = arith.constant 0 : index
      %28 = vector.load %arg6[%c0_23, %c0_24] : memref<1x128xf32, #tpu.memory_space<vmem>>, vector<1x128xf32>
      tpu.vector_store %arg6[%c0_23, %c0_24], %27 {strides = array<i32>} : memref<1x128xf32, #tpu.memory_space<vmem>>, vector<1x128xf32>,
    } else {
    }
    return
  }
  func.func @transform_0(%arg0: i32, %arg1: i32) -> (i32, i32) {
    %c0_i32 = arith.constant 0 : i32
    return %arg0, %arg1 : i32, i32
  }
  func.func @transform_1(%arg0: i32, %arg1: i32) -> (i32, i32) {
    %c0_i32 = arith.constant 0 : i32
    %c0_i32_0 = arith.constant 0 : i32
    return %arg1, %c0_i32 : i32, i32
  }
  func.func @transform_2(%arg0: i32, %arg1: i32) -> (i32, i32) {
    %c0_i32 = arith.constant 0 : i32
    %c0_i32_0 = arith.constant 0 : i32
    return %arg0, %c0_i32 : i32, i32
  }
  func.func @transform_3(%arg0: i32, %arg1: i32) -> (i32, i32) {
    %c0_i32 = arith.constant 0 : i32
    %c0_i32_0 = arith.constant 0 : i32
    %c0_i32_1 = arith.constant 0 : i32
    return %c0_i32, %c0_i32_0 : i32, i32
  }
  func.func @transform_4(%arg0: i32, %arg1: i32) -> (i32, i32) {
    %c0_i32 = arith.constant 0 : i32
    %c0_i32_0 = arith.constant 0 : i32
    %c0_i32_1 = arith.constant 0 : i32
    return %c0_i32, %c0_i32_0 : i32, i32
  }
}

</mosaic_0001>

<bundles_post_ra>
// kernel: unet_down.3
= control target key start
LH: loop header
LB: loop body
LE: loop exit
PB: predicated region body
PF: predicated region fallthrough
CT: control target
= control target key end

     0   :  { %s305_s0 = inlined_call_operand.vmem [shape: f32[128,128], index: 0, kind: input, shape index: {}, may-alias: {0,3}]   ;;  %s306_s1 = inlined_call_operand.vmem [shape: f32[1,128], index: 1, kind: input, shape index: {}]   ;;  %s307_s2 = inlined_call_operand.vmem [shape: f32[1,128], index: 2, kind: input, shape index: {}]   ;;  %s308_s3 = inlined_call_operand.vmem [shape: f32[128,128], index: 3, kind: output, shape index: {}, may-alias: {0,3}]  }
   0x1   :  { %v14_v0 = vld [vmem:[%s305_s0] sm:$0xff]  ;;  %v15_v4 = vld [vmem:[%s305_s0 + $0x8] sm:$0xff]  ;;  %v16_v5 = vld [vmem:[%s305_s0 + $0x10] sm:$0xff] }
   0x2   :  { %v172_v1 = vld [vmem:[%s306_s1] ss:$0 sm:$0xff]  ;;  %v17_v6 = vld [vmem:[%s305_s0 + $0x18] sm:$0xff]  ;;  %v19_v11 = vld [vmem:[%s305_s0 + $0x28] sm:$0xff] }
   0x3   :  { %v177_v2 = vld [vmem:[%s307_s2] ss:$0 sm:$0xff]  ;;  %v37_v3 = vmul.f32 %v172_v1, %v14_v0  ;;  %v38_v7 = vmul.f32 %v172_v1, %v15_v4  ;;  %v39_v8 = vmul.f32 %v172_v1, %v16_v5  ;;  %v40_v9 = vmul.f32 %v172_v1, %v17_v6  ;;  %v20_v12 = vld [vmem:[%s305_s0 + $0x30] sm:$0xff]  ;;  %v21_v17 = vld [vmem:[%s305_s0 + $0x38] sm:$0xff] }
   0x4   :  { %v18_v10 = vld [vmem:[%s305_s0 + $0x20] sm:$0xff]  ;;  %v42_v15 = vmul.f32 %v172_v1, %v19_v11  ;;  %v43_v16 = vmul.f32 %v172_v1, %v20_v12  ;;  %v44_v21 = vmul.f32 %v172_v1, %v21_v17  ;;  %v23_v30 = vld [vmem:[%s305_s0 + $0x48] sm:$0xff]  ;;  %v24_v31 = vld [vmem:[%s305_s0 + $0x50] sm:$0xff] }
   0x5   :  { %v60_v13 = vadd.f32 %v177_v2, %v37_v3  ;;  %v41_v14 = vmul.f32 %v172_v1, %v18_v10  ;;  %v61_v18 = vadd.f32 %v177_v2, %v38_v7  ;;  %v62_v19 = vadd.f32 %v177_v2, %v39_v8  ;;  %v22_v25 = vld [vmem:[%s305_s0 + $0x40] sm:$0xff] }
   0x6   :  { %v63_v20 = vadd.f32 %v177_v2, %v40_v9  ;;  %v65_v24 = vadd.f32 %v177_v2, %v42_v15  ;;  %v66_v37 = vadd.f32 %v177_v2, %v43_v16  ;;  %v67_v38 = vadd.f32 %v177_v2, %v44_v21 }
   0x7   :  { %vm76_vm0 = vcmp.ge.f32.partialorder %v60_v13, 0.0  ;;  %v92_v22 = vmul.f32 0.2, %v60_v13  ;;  %v64_v23 = vadd.f32 %v177_v2, %v41_v14  ;;  %vm77_vm1 = vcmp.ge.f32.partialorder %v61_v18, 0.0 }
   0x8   :  { %v93_v26 = vmul.f32 0.2, %v61_v18  ;;  %vm78_vm2 = vcmp.ge.f32.partialorder %v62_v19, 0.0  ;;  %v94_v27 = vmul.f32 0.2, %v62_v19  ;;  %vm79_vm3 = vcmp.ge.f32.partialorder %v63_v20, 0.0 }
   0x9   :  { %v108_v28 = vsel %vm76_vm0, %v60_v13, %v92_v22  ;;  %v95_v29 = vmul.f32 0.2, %v63_v20  ;;  %vm80_vm4 = vcmp.ge.f32.partialorder %v64_v23, 0.0  ;;  %v96_v34 = vmul.f32 0.2, %v64_v23 }
   0xa   :  { %124 = vst [vmem:[%s308_s3] sm:$0xff] %v108_v28  ;;  %v109_v32 = vsel %vm77_vm1, %v61_v18, %v93_v26  ;;  %v110_v33 = vsel %vm78_vm2, %v62_v19, %v94_v27  ;;  %vm81_vm5 = vcmp.ge.f32.partialorder %v65_v24, 0.0  ;;  %v97_v36 = vmul.f32 0.2, %v65_v24 }
   0xb   :  { %125 = vst [vmem:[%s308_s3 + $0x8] sm:$0xff] %v109_v32  ;;  %126 = vst [vmem:[%s308_s3 + $0x10] sm:$0xff] %v110_v33  ;;  %v111_v35 = vsel %vm79_vm3, %v63_v20, %v95_v29  ;;  %v112_v39 = vsel %vm80_vm4, %v64_v23, %v96_v34  ;;  %v45_v40 = vmul.f32 %v172_v1, %v22_v25  ;;  %vm82_vm6 = vcmp.ge.f32.partialorder %v66_v37, 0.0 }
   0xc   :  { %127 = vst [vmem:[%s308_s3 + $0x18] sm:$0xff] %v111_v35  ;;  %v46_v41 = vmul.f32 %v172_v1, %v23_v30  ;;  %v47_v42 = vmul.f32 %v172_v1, %v24_v31  ;;  %v113_v46 = vsel %vm81_vm5, %v65_v24, %v97_v36  ;;  %v98_v47 = vmul.f32 0.2, %v66_v37 }
   0xd   :  { %vm83_vm7 = vcmp.ge.f32.partialorder %v67_v38, 0.0  ;;  %v99_v48 = vmul.f32 0.2, %v67_v38  ;;  %v68_v49 = vadd.f32 %v177_v2, %v45_v40 }
   0xe   :  { %v69_v50 = vadd.f32 %v177_v2, %v46_v41  ;;  %v70_v51 = vadd.f32 %v177_v2, %v47_v42  ;;  %v114_v52 = vsel %vm82_vm6, %v66_v37, %v98_v47 }
   0xf   :  { %v115_v57 = vsel %vm83_vm7, %v67_v38, %v99_v48  ;;  %vm84_vm8 = vcmp.ge.f32.partialorder %v68_v49, 0.0  ;;  %v100_v58 = vmul.f32 0.2, %v68_v49 }
  0x10   :  { %vm85_vm9 = vcmp.ge.f32.partialorder %v69_v50, 0.0  ;;  %v101_v59 = vmul.f32 0.2, %v69_v50  ;;  %vm86_vm10 = vcmp.ge.f32.partialorder %v70_v51, 0.0  ;;  %v102_v60 = vmul.f32 0.2, %v70_v51 }
  0x11   :  { %v116_v62 = vsel %vm84_vm8, %v68_v49, %v100_v58 }
  0x12   :  { %v117_v5 = vsel %vm85_vm9, %v69_v50, %v101_v59  ;;  %v118_v6 = vsel %vm86_vm10, %v70_v51, %v102_v60 }
  0x13   :  { %v25_v43 = vld [vmem:[%s305_s0 + $0x58] sm:$0xff]  ;;  %v26_v44 = vld [vmem:[%s305_s0 + $0x60] sm:$0xff]  ;;  %v27_v45 = vld [vmem:[%s305_s0 + $0x68] sm:$0xff] }
  0x14   :  { %128 = vst [vmem:[%s308_s3 + $0x20] sm:$0xff] %v112_v39  ;;  %129 = vst [vmem:[%s308_s3 + $0x28] sm:$0xff] %v113_v46  ;;  %v48_v53 = vmul.f32 %v172_v1, %v25_v43  ;;  %v49_v54 = vmul.f32 %v172_v1, %v26_v44  ;;  %v50_v55 = vmul.f32 %v172_v1, %v27_v45 }
  0x16   :  { %v71_v61 = vadd.f32 %v177_v2, %v48_v53  ;;  %v72_v63 = vadd.f32 %v177_v2, %v49_v54  ;;  %v73_v0 = vadd.f32 %v177_v2, %v50_v55 }
  0x18   :  { %vm87_vm11 = vcmp.ge.f32.partialorder %v71_v61, 0.0  ;;  %v103_v7 = vmul.f32 0.2, %v71_v61  ;;  %vm88_vm12 = vcmp.ge.f32.partialorder %v72_v63, 0.0  ;;  %v104_v8 = vmul.f32 0.2, %v72_v63 }
  0x19   :  { %vm89_vm13 = vcmp.ge.f32.partialorder %v73_v0, 0.0  ;;  %v105_v9 = vmul.f32 0.2, %v73_v0 }
  0x1a   :  { %v119_v10 = vsel %vm87_vm11, %v71_v61, %v103_v7  ;;  %v120_v13 = vsel %vm88_vm12, %v72_v63, %v104_v8 }
  0x1b   :  { %v28_v56 = vld [vmem:[%s305_s0 + $0x70] sm:$0xff]  ;;  %v121_v14 = vsel %vm89_vm13, %v73_v0, %v105_v9 }
  0x1c   :  { %130 = vst [vmem:[%s308_s3 + $0x30] sm:$0xff] %v114_v52  ;;  %131 = vst [vmem:[%s308_s3 + $0x38] sm:$0xff] %v115_v57  ;;  %v51_v3 = vmul.f32 %v172_v1, %v28_v56 }
  0x1e   :  { %v74_v11 = vadd.f32 %v177_v2, %v51_v3 }
  0x20   :  { %vm90_vm14 = vcmp.ge.f32.partialorder %v74_v11, 0.0  ;;  %v106_v15 = vmul.f32 0.2, %v74_v11 }
  0x22   :  { %v122_v17 = vsel %vm90_vm14, %v74_v11, %v106_v15 }
  0x23   :  { %v29_v4 = vld [vmem:[%s305_s0 + $0x78] sm:$0xff] }
  0x24   :  { %132 = vst [vmem:[%s308_s3 + $0x40] sm:$0xff] %v116_v62  ;;  %133 = vst [vmem:[%s308_s3 + $0x48] sm:$0xff] %v117_v5  ;;  %v52_v12 = vmul.f32 %v172_v1, %v29_v4 }
  0x25   :  { %134 = vst [vmem:[%s308_s3 + $0x50] sm:$0xff] %v118_v6  ;;  %135 = vst [vmem:[%s308_s3 + $0x58] sm:$0xff] %v119_v10 }
  0x26   :  { %136 = vst [vmem:[%s308_s3 + $0x60] sm:$0xff] %v120_v13  ;;  %137 = vst [vmem:[%s308_s3 + $0x68] sm:$0xff] %v121_v14  ;;  %v75_v16 = vadd.f32 %v177_v2, %v52_v12 }
  0x27   :  { %138 = vst [vmem:[%s308_s3 + $0x70] sm:$0xff] %v122_v17 }
  0x28   :  { %vm91_vm15 = vcmp.ge.f32.partialorder %v75_v16, 0.0  ;;  %v107_v1 = vmul.f32 0.2, %v75_v16 }
  0x2a   :  { %v123_v18 = vsel %vm91_vm15, %v75_v16, %v107_v1 }
  0x2b   :  { %139 = vst [vmem:[%s308_s3 + $0x78] sm:$0xff] %v123_v18 }

// kernel: unet_down.2
= control target key start
LH: loop header
LB: loop body
LE: loop exit
PB: predicated region body
PF: predicated region fallthrough
CT: control target
= control target key end

     0   :  { %v507_v16 = vmov 0.0   ;;  %s647_s1 = inlined_call_operand.vmem [shape: bf16[128,128], index: 1, kind: input, shape index: {}]   ;;  %s648_s0 = inlined_call_operand.vmem [shape: bf16[128,128], index: 0, kind: input, shape index: {}]   ;;  %s649_s3 = inlined_call_operand.vmem [shape: f32[1,128], index: 3, kind: output, shape index: {1}]   ;;  %s650_s4 = inlined_call_operand.vmem [shape: f32[1,128], index: 4, kind: output, shape index: {2}]   ;;  %s651_s2 = inlined_call_operand.vmem [shape: f32[128,128], index: 2, kind: output, shape index: {0}]  }
   0x1   :  { %v491_v0 = vld [vmem:[%s647_s1] sm:$0xff]   ;;  %v492_v1 = vld [vmem:[%s647_s1 + $0x8] sm:$0xff]   ;;  %v493_v2 = vld [vmem:[%s647_s1 + $0x10] sm:$0xff]   ;;  %21 = vst [vmem:[%s649_s3] sm:$0x1] %v507_v16 }
   0x2   :  { %442 = vmatprep.subr.bf16.mxu0 %v491_v0  ;;  %474 = vmatprep.subr.bf16.mxu1 %v491_v0  ;;  %v494_v3 = vld [vmem:[%s647_s1 + $0x18] sm:$0xff]   ;;  %v499_v4 = vld [vmem:[%s648_s0] sm:$0xff]   ;;  %v496_v7 = vld [vmem:[%s647_s1 + $0x28] sm:$0xff]   ;;  %22 = vst [vmem:[%s650_s4] sm:$0x1] %v507_v16 }
   0x3   :  { %443 = vmatpush3.bf16.msra.mxu0 %v491_v0  ;;  %482 = vmatpush3.bf16.msra.mxu1 %v491_v0  ;;  %v495_v5 = vld [vmem:[%s647_s1 + $0x20] sm:$0xff]   ;;  %v497_v8 = vld [vmem:[%s647_s1 + $0x30] sm:$0xff]   ;;  %v498_v9 = vld [vmem:[%s647_s1 + $0x38] sm:$0xff]  }
   0x4   :  { %444 = vmatprep.subr.bf16.mxu0 %v492_v1  ;;  %475 = vmatprep.subr.bf16.mxu1 %v492_v1  ;;  %v503_v6 = vld [vmem:[%s648_s0 + $0x20] sm:$0xff]   ;;  %v500_v10 = vld [vmem:[%s648_s0 + $0x8] sm:$0xff]   ;;  %v501_v12 = vld [vmem:[%s648_s0 + $0x10] sm:$0xff]  }
   0x5   :  { %458 = vmatprep.mubr.bf16.mxu0 %v499_v4  ;;  %466 = vmatprep.mubr.bf16.mxu1 %v503_v6  ;;  %v504_v11 = vld [vmem:[%s648_s0 + $0x28] sm:$0xff]   ;;  %v505_v13 = vld [vmem:[%s648_s0 + $0x30] sm:$0xff]   ;;  %v502_v14 = vld [vmem:[%s648_s0 + $0x18] sm:$0xff]  }
   0x6   :  { %v506_v15 = vld [vmem:[%s648_s0 + $0x38] sm:$0xff]  }
   0x7   :  { %445 = vmatpush3.bf16.msra.mxu0 %v492_v1  ;;  %483 = vmatpush3.bf16.msra.mxu1 %v492_v1 }
   0x8   :  { %446 = vmatprep.subr.bf16.mxu0 %v493_v2  ;;  %476 = vmatprep.subr.bf16.mxu1 %v493_v2 }
   0xb   :  { %447 = vmatpush3.bf16.msra.mxu0 %v493_v2  ;;  %484 = vmatpush3.bf16.msra.mxu1 %v493_v2 }
   0xc   :  { %448 = vmatprep.subr.bf16.mxu0 %v494_v3  ;;  %477 = vmatprep.subr.bf16.mxu1 %v494_v3 }
   0xf   :  { %449 = vmatpush3.bf16.msra.mxu0 %v494_v3  ;;  %485 = vmatpush3.bf16.msra.mxu1 %v494_v3 }
  0x10   :  { %450 = vmatprep.subr.bf16.mxu0 %v495_v5  ;;  %478 = vmatprep.subr.bf16.mxu1 %v495_v5 }
  0x13   :  { %451 = vmatpush3.bf16.msra.mxu0 %v495_v5  ;;  %486 = vmatpush3.bf16.msra.mxu1 %v495_v5 }
  0x14   :  { %452 = vmatprep.subr.bf16.mxu0 %v496_v7  ;;  %479 = vmatprep.subr.bf16.mxu1 %v496_v7 }
  0x17   :  { %453 = vmatpush3.bf16.msra.mxu0 %v496_v7  ;;  %487 = vmatpush3.bf16.msra.mxu1 %v496_v7 }
  0x18   :  { %454 = vmatprep.subr.bf16.mxu0 %v497_v8  ;;  %480 = vmatprep.subr.bf16.mxu1 %v497_v8 }
  0x1b   :  { %455 = vmatpush3.bf16.msra.mxu0 %v497_v8  ;;  %488 = vmatpush3.bf16.msra.mxu1 %v497_v8 }
  0x1c   :  { %456 = vmatprep.subr.bf16.mxu0 %v498_v9  ;;  %481 = vmatprep.subr.bf16.mxu1 %v498_v9 }
  0x1f   :  { %457 = vmatpush3.bf16.msra.mxu0 %v498_v9  ;;  %489 = vmatpush3.bf16.msra.mxu1 %v498_v9 }
  0x22   :  { %459 = vmatmul.mubr.bf16.vlgmr.msra.gmra.mrb[0].mxu0 %v500_v10  ;;  %467 = vmatmul.mubr.bf16.vlgmr.msra.gmra.mrb[0].mxu1 %v504_v11 }
  0x23   :  { %462 = vmatprep.mubr.bf16.mxu0 %v501_v12  ;;  %470 = vmatprep.mubr.bf16.mxu1 %v505_v13 }
  0x2a   :  { %463 = vmatmul.mubr.bf16.gmra.mrb[4].mxu0 %v502_v14  ;;  %471 = vmatmul.mubr.bf16.gmra.mrb[4].mxu1 %v506_v15 }
  0xf5   :  { %v460_v17 = vpop.f32.mrb[0].mxu0  ;;  %v468_v18 = vpop.f32.mrb[0].mxu1 }
  0xf6   :  { %v220_v19 = vpop.f32.mrb[1].mxu0  ;;  %v252_v20 = vpop.f32.mrb[1].mxu1  ;;  %301 = vst [vmem:[%s651_s2 + $0x10] sm:$0xff] %v460_v17  ;;  %309 = vst [vmem:[%s651_s2 + $0x50] sm:$0xff] %v468_v18  ;;  %v361_v28 = vmul.f32 %v460_v17, %v460_v17  ;;  %v369_v60 = vmul.f32 %v468_v18, %v468_v18 }
  0xf7   :  { %v461_v21 = vpop.f32.mrb[2].mxu0  ;;  %v469_v22 = vpop.f32.mrb[2].mxu1  ;;  %299 = vst [vmem:[%s651_s2] sm:$0xff] %v220_v19  ;;  %307 = vst [vmem:[%s651_s2 + $0x40] sm:$0xff] %v252_v20  ;;  %v359_v25 = vmul.f32 %v220_v19, %v220_v19  ;;  %v367_v54 = vmul.f32 %v252_v20, %v252_v20 }
  0xf8   :  { %v223_v23 = vpop.f32.mrb[3].mxu0  ;;  %v255_v24 = vpop.f32.mrb[3].mxu1  ;;  %302 = vst [vmem:[%s651_s2 + $0x18] sm:$0xff] %v461_v21  ;;  %310 = vst [vmem:[%s651_s2 + $0x58] sm:$0xff] %v469_v22  ;;  %v362_v33 = vmul.f32 %v461_v21, %v461_v21  ;;  %v370_v63 = vmul.f32 %v469_v22, %v469_v22 }
  0xf9   :  { %300 = vst [vmem:[%s651_s2 + $0x8] sm:$0xff] %v223_v23  ;;  %v335_v26 = vadd.f32 %v223_v23, %v220_v19  ;;  %v360_v27 = vmul.f32 %v223_v23, %v223_v23  ;;  %308 = vst [vmem:[%s651_s2 + $0x48] sm:$0xff] %v255_v24  ;;  %v368_v59 = vmul.f32 %v255_v24, %v255_v24 }
  0xfb   :  { %v336_v29 = vadd.f32 %v460_v17, %v335_v26  ;;  %v375_v30 = vadd.f32 %v360_v27, %v359_v25  ;;  %v358_v27 = vld [vmem:[%s650_s4] sm:$0x1] }
  0xfd   :  { %v464_v31 = vpop.f32.mrb[4].mxu0  ;;  %v472_v32 = vpop.f32.mrb[4].mxu1  ;;  %v376_v36 = vadd.f32 %v375_v30, %v361_v28  ;;  %v337_v37 = vadd.f32 %v461_v21, %v336_v29 }
  0xfe   :  { %v236_v34 = vpop.f32.mrb[5].mxu0  ;;  %v268_v35 = vpop.f32.mrb[5].mxu1  ;;  %305 = vst [vmem:[%s651_s2 + $0x30] sm:$0xff] %v464_v31  ;;  %313 = vst [vmem:[%s651_s2 + $0x70] sm:$0xff] %v472_v32  ;;  %v365_v48 = vmul.f32 %v464_v31, %v464_v31  ;;  %v373_v8 = vmul.f32 %v472_v32, %v472_v32 }
  0xff   :  { %v465_v38 = vpop.f32.mrb[6].mxu0  ;;  %v473_v39 = vpop.f32.mrb[6].mxu1  ;;  %303 = vst [vmem:[%s651_s2 + $0x20] sm:$0xff] %v236_v34  ;;  %v338_v42 = vadd.f32 %v337_v37, %v236_v34  ;;  %v363_v43 = vmul.f32 %v236_v34, %v236_v34  ;;  %v377_v44 = vadd.f32 %v376_v36, %v362_v33  ;;  %311 = vst [vmem:[%s651_s2 + $0x60] sm:$0xff] %v268_v35 }
 0x100   :  { %v239_v40 = vpop.f32.mrb[7].mxu0  ;;  %v271_v41 = vpop.f32.mrb[7].mxu1  ;;  %306 = vst [vmem:[%s651_s2 + $0x38] sm:$0xff] %v465_v38  ;;  %314 = vst [vmem:[%s651_s2 + $0x78] sm:$0xff] %v473_v39  ;;  %v366_v51 = vmul.f32 %v465_v38, %v465_v38  ;;  %v371_v2 = vmul.f32 %v268_v35, %v268_v35  ;;  %v374_v11 = vmul.f32 %v473_v39, %v473_v39 }
 0x101   :  { %v378_v45 = vadd.f32 %v377_v44, %v363_v43  ;;  %304 = vst [vmem:[%s651_s2 + $0x28] sm:$0xff] %v239_v40  ;;  %v339_v46 = vadd.f32 %v338_v42, %v239_v40  ;;  %v364_v47 = vmul.f32 %v239_v40, %v239_v40  ;;  %312 = vst [vmem:[%s651_s2 + $0x68] sm:$0xff] %v271_v41 }
 0x102   :  { %v372_v7 = vmul.f32 %v271_v41, %v271_v41 }
 0x103   :  { %v340_v49 = vadd.f32 %v464_v31, %v339_v46  ;;  %v379_v50 = vadd.f32 %v378_v45, %v364_v47 }
 0x105   :  { %v380_v52 = vadd.f32 %v379_v50, %v365_v48  ;;  %v341_v53 = vadd.f32 %v465_v38, %v340_v49 }
 0x107   :  { %v342_v55 = vadd.f32 %v341_v53, %v252_v20  ;;  %v381_v56 = vadd.f32 %v380_v52, %v366_v51 }
 0x109   :  { %v382_v57 = vadd.f32 %v381_v56, %v367_v54  ;;  %v343_v58 = vadd.f32 %v342_v55, %v255_v24  ;;  %v334_v24 = vld [vmem:[%s649_s3] sm:$0x1] }
 0x10b   :  { %v344_v61 = vadd.f32 %v468_v18, %v343_v58  ;;  %v383_v62 = vadd.f32 %v382_v57, %v368_v59 }
 0x10d   :  { %v384_v0 = vadd.f32 %v383_v62, %v369_v60  ;;  %v345_v1 = vadd.f32 %v469_v22, %v344_v61 }
 0x10f   :  { %v346_v3 = vadd.f32 %v345_v1, %v268_v35  ;;  %v385_v4 = vadd.f32 %v384_v0, %v370_v63 }
 0x111   :  { %v386_v5 = vadd.f32 %v385_v4, %v371_v2  ;;  %v347_v6 = vadd.f32 %v346_v3, %v271_v41 }
 0x113   :  { %v348_v9 = vadd.f32 %v472_v32, %v347_v6  ;;  %v387_v10 = vadd.f32 %v386_v5, %v372_v7 }
 0x115   :  { %v349_v12 = vadd.f32 %v473_v39, %v348_v9  ;;  %v388_v13 = vadd.f32 %v387_v10, %v373_v8 }
 0x117   :  { %v350_v14 = vrot.slane %v349_v12, 4  ;;  %v389_v15 = vadd.f32 %v388_v13, %v374_v11 }
 0x119   :  { %v351_v16 = vadd.f32 %v350_v14, %v349_v12  ;;  %v390_v17 = vrot.slane %v389_v15, 4 }
 0x11b   :  { %v352_v18 = vrot.slane %v351_v16, 2  ;;  %v391_v19 = vadd.f32 %v390_v17, %v389_v15 }
 0x11d   :  { %v353_v20 = vadd.f32 %v352_v18, %v351_v16  ;;  %v392_v21 = vrot.slane %v391_v19, 2 }
 0x11f   :  { %v354_v22 = vrot.slane %v353_v20, 1  ;;  %v393_v23 = vadd.f32 %v392_v21, %v391_v19 }
 0x121   :  { %v355_v25 = vadd.f32 %v354_v22, %v353_v20  ;;  %v394_v26 = vrot.slane %v393_v23, 1 }
 0x123   :  { %v356_v28 = vadd.f32 %v355_v25, %v334_v24  ;;  %v395_v29 = vadd.f32 %v394_v26, %v393_v23 }
 0x125   :  { %357 = vst [vmem:[%s649_s3] sm:$0x1] %v356_v28  ;;  %v396_v30 = vadd.f32 %v395_v29, %v358_v27 }
 0x127   :  { %397 = vst [vmem:[%s650_s4] sm:$0x1] %v396_v30 }

</bundles_post_ra>
